<compile_context>
chip_gen: v7x
topology: tpu7x:2x2x1
jax: 0.10.0
libtpu: 0.0.40
codegen_flags: <defaults>
</compile_context>

<pallas_src>
import functools

import jax
import jax.numpy as jnp
import numpy as np
from jax.experimental import pallas as pl
from jax.experimental.pallas import tpu as pltpu

LOG_STD_MAX = 2.0
LOG_STD_MIN = -20.0

_LOG_2PI = float(np.log(2.0 * np.pi))
_LOG_2 = float(np.log(2.0))


def _actor_kernel(obs_ref, noise_ref,
                  w1_ref, b1_ref, w2_ref, b2_ref,
                  wh_ref, bh_ref,
                  out_ref,
                  *, act_dim, act_limit, out_rows):
    # Everything is feature-major: activations are (features, tb), tb lane-dense.
    obs_t = obs_ref[...]                                   # (obs_dim, tb)

    # MLP trunk: (Linear -> ReLU) x 2   (activation == output_activation).
    h = jnp.dot(w1_ref[...], obs_t, preferred_element_type=jnp.float32) + b1_ref[...]
    h = jnp.maximum(h, 0.0).astype(w2_ref.dtype)           # (h1, tb)
    h = jnp.dot(w2_ref[...], h, preferred_element_type=jnp.float32) + b2_ref[...]
    h = jnp.maximum(h, 0.0).astype(wh_ref.dtype)           # (h2, tb)

    # Fused mu / log_std head: single MXU pass, split with static sublane slices.
    head = jnp.dot(wh_ref[...], h, preferred_element_type=jnp.float32) + bh_ref[...]
    mu = head[:act_dim, :]                                 # (act_dim, tb)
    log_std = jnp.clip(head[act_dim:, :], LOG_STD_MIN, LOG_STD_MAX)
    std = jnp.exp(log_std)

    # rsample: pi = mu + std * eps   (eps supplied by wrapper).
    eps = noise_ref[...]                                   # (act_dim, tb)
    pi = mu + std * eps

    # Normal(mu, std).log_prob(pi).sum over act dim: (pi - mu)/std == eps.
    # Reduction over features is a cheap sublane reduce -> (1, tb).
    logp = jnp.sum(-0.5 * (eps * eps) - log_std, axis=0, keepdims=True)
    logp = logp - 0.5 * act_dim * _LOG_2PI

    # Tanh-squash correction: 2*(log 2 - pi - softplus(-2 pi)), summed over act dim.
    corr = 2.0 * (_LOG_2 - pi - jax.nn.softplus(-2.0 * pi))
    logp = logp - jnp.sum(corr, axis=0, keepdims=True)     # (1, tb)

    pi_out = act_limit * jnp.tanh(pi)                      # (act_dim, tb)

    # Batch-major-in-lanes packed output: rows [pi | logp | zero pad], one
    # full-width unmasked store.  out_rows is act_dim+1 rounded up to 8.
    tb = pi_out.shape[1]
    parts = [pi_out, logp]
    pad_rows = out_rows - act_dim - 1
    if pad_rows > 0:
        parts.append(jnp.zeros((pad_rows, tb), jnp.float32))
    out_ref[...] = jnp.concatenate(parts, axis=0).astype(out_ref.dtype)


def squashed_gaussian_actor(obs, noise, params, act_limit, *,
                            block_b=4096, trunk_dtype=jnp.float32):
    """Actor forward pass (deterministic=False, with_logprob=True)."""
    B, obs_dim = obs.shape
    h1 = params["w1"].shape[1]
    h2 = params["w2"].shape[1]
    act_dim = params["wmu"].shape[1]

    out_rows = max(8, pl.cdiv(act_dim + 1, 8) * 8)

    # Feature-major weights: (out_features, in_features); biases (out_features, 1).
    w1_t = params["w1"].T.astype(trunk_dtype)
    b1_t = params["b1"].T
    w2_t = params["w2"].T.astype(trunk_dtype)
    b2_t = params["b2"].T
    # Fuse the two heads into one (2*act_dim, h2) matmul.
    wh_t = jnp.concatenate([params["wmu"], params["wls"]], axis=1).T.astype(trunk_dtype)
    bh_t = jnp.concatenate([params["bmu"], params["bls"]], axis=1).T

    # Batch tile: lane-dense (multiple of 128), bounded by block_b.  If the
    # whole batch would be one tile but is >= 256 rows, split it so the grid
    # has >= 2 steps (v7x megacore sharding via "parallel").
    Bp = pl.cdiv(B, 128) * 128
    tb = max(128, (min(block_b, Bp) // 128) * 128)
    if tb >= Bp and Bp >= 256:
        tb = max(128, ((Bp // 2) // 128) * 128)
    Bp = pl.cdiv(Bp, tb) * tb

    # Pad batch, then transpose so the batch sits in the lane dimension.
    obs_t = jnp.pad(obs, ((0, Bp - B), (0, 0))).T.astype(trunk_dtype)    # (obs_dim, Bp)
    noise_t = jnp.pad(noise, ((0, Bp - B), (0, 0))).T                    # (act_dim, Bp)

    kernel = functools.partial(_actor_kernel, act_dim=act_dim,
                               act_limit=float(act_limit), out_rows=out_rows)

    def resident(shape):  # weights/biases: constant index -> stay VMEM-resident
        return pl.BlockSpec(shape, lambda i: (0, 0))

    trunk_bytes = jnp.dtype(trunk_dtype).itemsize
    cost = pl.CostEstimate(
        flops=2 * Bp * (obs_dim * h1 + h1 * h2 + h2 * 2 * act_dim),
        transcendentals=4 * Bp * act_dim,  # exp, softplus(exp+log), tanh
        bytes_accessed=(trunk_bytes * (Bp * obs_dim + obs_dim * h1
                                       + h1 * h2 + h2 * 2 * act_dim)
                        + 4 * (Bp * act_dim + h1 + h2 + 2 * act_dim
                               + Bp * out_rows)),
    )

    out = pl.pallas_call(
        kernel,
        out_shape=jax.ShapeDtypeStruct((out_rows, Bp), jnp.float32),
        grid=(Bp // tb,),
        in_specs=[
            pl.BlockSpec((obs_dim, tb), lambda i: (0, i)),
            pl.BlockSpec((act_dim, tb), lambda i: (0, i)),
            resident(w1_t.shape), resident(b1_t.shape),
            resident(w2_t.shape), resident(b2_t.shape),
            resident(wh_t.shape), resident(bh_t.shape),
        ],
        out_specs=pl.BlockSpec((out_rows, tb), lambda i: (0, i)),
        compiler_params=pltpu.CompilerParams(
            dimension_semantics=("parallel",)),
        cost_estimate=cost,
    )(obs_t, noise_t, w1_t, b1_t, w2_t, b2_t, wh_t, bh_t)

    pi = out[:act_dim, :B].T          # (B, act_dim)
    logp = out[act_dim, :B]           # (B,)
    return pi, logp


def _init_linear(key, fan_in, fan_out):
    # Deterministic init mimicking PyTorch's default U(-1/sqrt(fan_in), 1/sqrt(fan_in)).
    kw, kb = jax.random.split(key)
    bound = 1.0 / np.sqrt(fan_in)
    w = jax.random.uniform(kw, (fan_in, fan_out), jnp.float32, -bound, bound)
    b = jax.random.uniform(kb, (1, fan_out), jnp.float32, -bound, bound)
    return w, b


def _reference_forward(obs, noise, params, act_limit):
    h = jnp.maximum(obs @ params["w1"] + params["b1"], 0.0)
    h = jnp.maximum(h @ params["w2"] + params["b2"], 0.0)
    mu = h @ params["wmu"] + params["bmu"]
    log_std = jnp.clip(h @ params["wls"] + params["bls"], LOG_STD_MIN, LOG_STD_MAX)
    std = jnp.exp(log_std)
    pi = mu + std * noise
    logp = jnp.sum(-0.5 * ((pi - mu) / std) ** 2 - log_std
                   - 0.5 * jnp.log(2.0 * jnp.pi), axis=-1)
    logp -= jnp.sum(2.0 * (jnp.log(2.0) - pi - jax.nn.softplus(-2.0 * pi)), axis=-1)
    return act_limit * jnp.tanh(pi), logp


if __name__ == "__main__":
    B, obs_dim, act_dim = 8, 16, 4
    hidden_sizes = (32, 32)
    act_limit = 2.0

    key = jax.random.PRNGKey(0)
    k_obs, k_noise, k1, k2, k3, k4 = jax.random.split(key, 6)

    obs = jax.random.normal(k_obs, (B, obs_dim), jnp.float32)
    noise = jax.random.normal(k_noise, (B, act_dim), jnp.float32)  # eps for rsample

    w1, b1 = _init_linear(k1, obs_dim, hidden_sizes[0])
    w2, b2 = _init_linear(k2, hidden_sizes[0], hidden_sizes[1])
    wmu, bmu = _init_linear(k3, hidden_sizes[1], act_dim)
    wls, bls = _init_linear(k4, hidden_sizes[1], act_dim)
    params = dict(w1=w1, b1=b1, w2=w2, b2=b2, wmu=wmu, bmu=bmu, wls=wls, bls=bls)

    pi_action, logp_pi = squashed_gaussian_actor(obs, noise, params, act_limit)
    jax.block_until_ready((pi_action, logp_pi))

    pi_ref, logp_ref = _reference_forward(obs, noise, params, act_limit)
    assert pi_action.shape == (B, act_dim) and logp_pi.shape == (B,)
    np.testing.assert_allclose(np.asarray(pi_action), np.asarray(pi_ref),
                               rtol=1e-4, atol=1e-4)
    np.testing.assert_allclose(np.asarray(logp_pi), np.asarray(logp_ref),
                               rtol=1e-4, atol=1e-4)
    print("KERNEL_OK")
</pallas_src>

<mosaic_0001>
module attributes {stable_mosaic.version = 11 : i64} {
  func.func @_actor_kernel(%arg0: i32, %arg1: memref<16x128xf32, #tpu.memory_space<vmem>>, %arg2: memref<4x128xf32, #tpu.memory_space<vmem>>, %arg3: memref<32x16xf32, #tpu.memory_space<vmem>>, %arg4: memref<32x1xf32, #tpu.memory_space<vmem>>, %arg5: memref<32x32xf32, #tpu.memory_space<vmem>>, %arg6: memref<32x1xf32, #tpu.memory_space<vmem>>, %arg7: memref<8x32xf32, #tpu.memory_space<vmem>>, %arg8: memref<8x1xf32, #tpu.memory_space<vmem>>, %arg9: memref<8x128xf32, #tpu.memory_space<vmem>>) attributes {dimension_semantics = [#tpu.dimension_semantics<parallel>], iteration_bounds = array<i64: 1>, scalar_prefetch = 0 : i64, scratch_operands = 0 : i64, tpu.core_type = #tpu.core_type<tc>, window_params = [{transform_indices = @transform_0, window_bounds = array<i64: 16, 128>}, {transform_indices = @transform_1, window_bounds = array<i64: 4, 128>}, {pipeline_mode = #tpu.pipeline_mode<synchronous>, transform_indices = @transform_2, window_bounds = array<i64: 32, 16>}, {pipeline_mode = #tpu.pipeline_mode<synchronous>, transform_indices = @transform_3, window_bounds = array<i64: 32, 1>}, {pipeline_mode = #tpu.pipeline_mode<synchronous>, transform_indices = @transform_4, window_bounds = array<i64: 32, 32>}, {pipeline_mode = #tpu.pipeline_mode<synchronous>, transform_indices = @transform_5, window_bounds = array<i64: 32, 1>}, {pipeline_mode = #tpu.pipeline_mode<synchronous>, transform_indices = @transform_6, window_bounds = array<i64: 8, 32>}, {pipeline_mode = #tpu.pipeline_mode<synchronous>, transform_indices = @transform_7, window_bounds = array<i64: 8, 1>}, {transform_indices = @transform_8, window_bounds = array<i64: 8, 128>}]} {
    %c0 = arith.constant 0 : index
    %c0_0 = arith.constant 0 : index
    %0 = vector.load %arg1[%c0, %c0_0] : memref<16x128xf32, #tpu.memory_space<vmem>>, vector<16x128xf32>
    %c0_1 = arith.constant 0 : index
    %c0_2 = arith.constant 0 : index
    %1 = vector.load %arg3[%c0_1, %c0_2] : memref<32x16xf32, #tpu.memory_space<vmem>>, vector<32x16xf32>
    %cst = arith.constant dense<0.000000e+00> : vector<32x128xf32>
    %2 = tpu.matmul %1, %0, %cst {dimension_numbers = #tpu.dot_dimension_numbers<[1], [0], [0], [1], [0, 0, 1, 1], [], []>} : vector<32x16xf32>, vector<16x128xf32>, vector<32x128xf32> -> vector<32x128xf32>
    %c0_3 = arith.constant 0 : index
    %c0_4 = arith.constant 0 : index
    %3 = vector.load %arg4[%c0_3, %c0_4] : memref<32x1xf32, #tpu.memory_space<vmem>>, vector<32x1xf32>
    %4 = vector.broadcast %3 : vector<32x1xf32> to vector<32x128xf32>
    %5 = arith.addf %2, %4 : vector<32x128xf32>
    %cst_5 = arith.constant 0.000000e+00 : f32
    %6 = vector.broadcast %cst_5 : f32 to vector<32x128xf32>
    %7 = arith.maximumf %5, %6 : vector<32x128xf32>
    %c0_6 = arith.constant 0 : index
    %c0_7 = arith.constant 0 : index
    %8 = vector.load %arg5[%c0_6, %c0_7] : memref<32x32xf32, #tpu.memory_space<vmem>>, vector<32x32xf32>
    %cst_8 = arith.constant dense<0.000000e+00> : vector<32x128xf32>
    %9 = tpu.matmul %8, %7, %cst_8 {dimension_numbers = #tpu.dot_dimension_numbers<[1], [0], [0], [1], [0, 0, 1, 1], [], []>} : vector<32x32xf32>, vector<32x128xf32>, vector<32x128xf32> -> vector<32x128xf32>
    %c0_9 = arith.constant 0 : index
    %c0_10 = arith.constant 0 : index
    %10 = vector.load %arg6[%c0_9, %c0_10] : memref<32x1xf32, #tpu.memory_space<vmem>>, vector<32x1xf32>
    %11 = vector.broadcast %10 : vector<32x1xf32> to vector<32x128xf32>
    %12 = arith.addf %9, %11 : vector<32x128xf32>
    %cst_11 = arith.constant 0.000000e+00 : f32
    %13 = vector.broadcast %cst_11 : f32 to vector<32x128xf32>
    %14 = arith.maximumf %12, %13 : vector<32x128xf32>
    %c0_12 = arith.constant 0 : index
    %c0_13 = arith.constant 0 : index
    %15 = vector.load %arg7[%c0_12, %c0_13] : memref<8x32xf32, #tpu.memory_space<vmem>>, vector<8x32xf32>
    %cst_14 = arith.constant dense<0.000000e+00> : vector<8x128xf32>
    %16 = tpu.matmul %15, %14, %cst_14 {dimension_numbers = #tpu.dot_dimension_numbers<[1], [0], [0], [1], [0, 0, 1, 1], [], []>} : vector<8x32xf32>, vector<32x128xf32>, vector<8x128xf32> -> vector<8x128xf32>
    %c0_15 = arith.constant 0 : index
    %c0_16 = arith.constant 0 : index
    %17 = vector.load %arg8[%c0_15, %c0_16] : memref<8x1xf32, #tpu.memory_space<vmem>>, vector<8x1xf32>
    %18 = vector.broadcast %17 : vector<8x1xf32> to vector<8x128xf32>
    %19 = arith.addf %16, %18 : vector<8x128xf32>
    %20 = vector.extract_strided_slice %19 {offsets = [0, 0], sizes = [4, 128], strides = [1, 1]} : vector<8x128xf32> to vector<4x128xf32>
    %21 = vector.extract_strided_slice %19 {offsets = [4, 0], sizes = [4, 128], strides = [1, 1]} : vector<8x128xf32> to vector<4x128xf32>
    %cst_17 = arith.constant -2.000000e+01 : f32
    %cst_18 = arith.constant 2.000000e+00 : f32
    %22 = vector.broadcast %cst_17 : f32 to vector<4x128xf32>
    %23 = arith.maximumf %22, %21 : vector<4x128xf32>
    %24 = vector.broadcast %cst_18 : f32 to vector<4x128xf32>
    %25 = arith.minimumf %24, %23 : vector<4x128xf32>
    %26 = math.exp %25 : vector<4x128xf32>
    %c0_19 = arith.constant 0 : index
    %c0_20 = arith.constant 0 : index
    %27 = vector.load %arg2[%c0_19, %c0_20] : memref<4x128xf32, #tpu.memory_space<vmem>>, vector<4x128xf32>
    %28 = arith.mulf %26, %27 : vector<4x128xf32>
    %29 = arith.addf %20, %28 : vector<4x128xf32>
    %30 = arith.mulf %27, %27 : vector<4x128xf32>
    %cst_21 = arith.constant -5.000000e-01 : f32
    %31 = vector.broadcast %cst_21 : f32 to vector<4x128xf32>
    %32 = arith.mulf %31, %30 : vector<4x128xf32>
    %33 = arith.subf %32, %25 : vector<4x128xf32>
    %cst_22 = arith.constant dense<0.000000e+00> : vector<128xf32>
    %34 = vector.multi_reduction <add>, %33, %cst_22 [0] : vector<4x128xf32> to vector<128xf32>
    %35 = vector.shape_cast %34 : vector<128xf32> to vector<1x128xf32>
    %cst_23 = arith.constant 3.67575407 : f32
    %36 = vector.broadcast %cst_23 : f32 to vector<1x128xf32>
    %37 = arith.subf %35, %36 : vector<1x128xf32>
    %cst_24 = arith.constant 0.693147182 : f32
    %38 = vector.broadcast %cst_24 : f32 to vector<4x128xf32>
    %39 = arith.subf %38, %29 : vector<4x128xf32>
    %cst_25 = arith.constant -2.000000e+00 : f32
    %40 = vector.broadcast %cst_25 : f32 to vector<4x128xf32>
    %41 = arith.mulf %40, %29 : vector<4x128xf32>
    %cst_26 = arith.constant 0.000000e+00 : f32
    %42 = vector.broadcast %cst_26 : f32 to vector<4x128xf32>
    %43 = arith.maximumf %41, %42 : vector<4x128xf32>
    %44 = vector.broadcast %cst_26 : f32 to vector<4x128xf32>
    %45 = arith.subf %41, %44 : vector<4x128xf32>
    %46 = arith.cmpf one, %45, %45 : vector<4x128xf32>
    %47 = vector.broadcast %cst_26 : f32 to vector<4x128xf32>
    %48 = arith.addf %41, %47 : vector<4x128xf32>
    %49 = math.absf %45 : vector<4x128xf32>
    %cst_27 = arith.constant 0.000000e+00 : f32
    %50 = vector.broadcast %cst_27 : f32 to vector<4x128xf32>
    %51 = arith.subf %50, %49 : vector<4x128xf32>
    %52 = math.exp %51 : vector<4x128xf32>
    %53 = math.log1p %52 : vector<4x128xf32>
    %54 = arith.addf %43, %53 : vector<4x128xf32>
    %55 = arith.select %46, %48, %54 : vector<4x128xi1>, vector<4x128xf32>
    %56 = arith.subf %39, %55 : vector<4x128xf32>
    %cst_28 = arith.constant 2.000000e+00 : f32
    %57 = vector.broadcast %cst_28 : f32 to vector<4x128xf32>
    %58 = arith.mulf %57, %56 : vector<4x128xf32>
    %cst_29 = arith.constant dense<0.000000e+00> : vector<128xf32>
    %59 = vector.multi_reduction <add>, %58, %cst_29 [0] : vector<4x128xf32> to vector<128xf32>
    %60 = vector.shape_cast %59 : vector<128xf32> to vector<1x128xf32>
    %61 = arith.subf %37, %60 : vector<1x128xf32>
    %62 = math.tanh %29 : vector<4x128xf32>
    %cst_30 = arith.constant 2.000000e+00 : f32
    %63 = vector.broadcast %cst_30 : f32 to vector<4x128xf32>
    %64 = arith.mulf %63, %62 : vector<4x128xf32>
    %cst_31 = arith.constant 0.000000e+00 : f32
    %65 = vector.broadcast %cst_31 : f32 to vector<3x128xf32>
    %66 = tpu.concatenate %64, %61, %65 in 0 : vector<4x128xf32>, vector<1x128xf32>, vector<3x128xf32> -> vector<8x128xf32>
    %c0_32 = arith.constant 0 : index
    %c0_33 = arith.constant 0 : index
    %67 = vector.load %arg9[%c0_32, %c0_33] : memref<8x128xf32, #tpu.memory_space<vmem>>, vector<8x128xf32>
    tpu.vector_store %arg9[%c0_32, %c0_33], %66 {strides = array<i32>} : memref<8x128xf32, #tpu.memory_space<vmem>>, vector<8x128xf32>,
    return
  }
  func.func @transform_0(%arg0: i32) -> (i32, i32) {
    %c0_i32 = arith.constant 0 : i32
    %c0_i32_0 = arith.constant 0 : i32
    return %c0_i32, %arg0 : i32, i32
  }
  func.func @transform_1(%arg0: i32) -> (i32, i32) {
    %c0_i32 = arith.constant 0 : i32
    %c0_i32_0 = arith.constant 0 : i32
    return %c0_i32, %arg0 : i32, i32
  }
  func.func @transform_2(%arg0: i32) -> (i32, i32) {
    %c0_i32 = arith.constant 0 : i32
    %c0_i32_0 = arith.constant 0 : i32
    %c0_i32_1 = arith.constant 0 : i32
    return %c0_i32, %c0_i32_0 : i32, i32
  }
  func.func @transform_3(%arg0: i32) -> (i32, i32) {
    %c0_i32 = arith.constant 0 : i32
    %c0_i32_0 = arith.constant 0 : i32
    %c0_i32_1 = arith.constant 0 : i32
    return %c0_i32, %c0_i32_0 : i32, i32
  }
  func.func @transform_4(%arg0: i32) -> (i32, i32) {
    %c0_i32 = arith.constant 0 : i32
    %c0_i32_0 = arith.constant 0 : i32
    %c0_i32_1 = arith.constant 0 : i32
    return %c0_i32, %c0_i32_0 : i32, i32
  }
  func.func @transform_5(%arg0: i32) -> (i32, i32) {
    %c0_i32 = arith.constant 0 : i32
    %c0_i32_0 = arith.constant 0 : i32
    %c0_i32_1 = arith.constant 0 : i32
    return %c0_i32, %c0_i32_0 : i32, i32
  }
  func.func @transform_6(%arg0: i32) -> (i32, i32) {
    %c0_i32 = arith.constant 0 : i32
    %c0_i32_0 = arith.constant 0 : i32
    %c0_i32_1 = arith.constant 0 : i32
    return %c0_i32, %c0_i32_0 : i32, i32
  }
  func.func @transform_7(%arg0: i32) -> (i32, i32) {
    %c0_i32 = arith.constant 0 : i32
    %c0_i32_0 = arith.constant 0 : i32
    %c0_i32_1 = arith.constant 0 : i32
    return %c0_i32, %c0_i32_0 : i32, i32
  }
  func.func @transform_8(%arg0: i32) -> (i32, i32) {
    %c0_i32 = arith.constant 0 : i32
    %c0_i32_0 = arith.constant 0 : i32
    return %c0_i32, %arg0 : i32, i32
  }
}

</mosaic_0001>

<bundles_post_ra>
// kernel: tpu_custom_call.1
= control target key start
LH: loop header
LB: loop body
LE: loop exit
PB: predicated region body
PF: predicated region fallthrough
CT: control target
= control target key end

     0   :  { %vm60_vm0 = vcmask 130048   ;;  %v571_v4 = vmov 0   ;;  %s708_s0 = inlined_call_operand.vmem [shape: f32[16,128], index: 0, kind: input, shape index: {}]   ;;  %s709_s1 = inlined_call_operand.vmem [shape: f32[4,128], index: 1, kind: input, shape index: {}]   ;;  %s710_s2 = inlined_call_operand.vmem [shape: f32[32,16], index: 2, kind: input, shape index: {}]   ;;  %s711_s3 = inlined_call_operand.vmem [shape: f32[32,1], index: 3, kind: input, shape index: {}]   ;;  %s712_s4 = inlined_call_operand.vmem [shape: f32[32,32], index: 4, kind: input, shape index: {}]   ;;  %s713_s5 = inlined_call_operand.vmem [shape: f32[32,1], index: 5, kind: input, shape index: {}]   ;;  %s714_s6 = inlined_call_operand.vmem [shape: f32[8,32], index: 6, kind: input, shape index: {}]   ;;  %s715_s7 = inlined_call_operand.vmem [shape: f32[8,1], index: 7, kind: input, shape index: {}]   ;;  %s716_s8 = inlined_call_operand.hbm [shape: f32[8,128], index: 8, kind: output, shape index: {}]  }
   0x1   :  { %v30_v0 = vld [vmem:[%s708_s0] sm:$0xff]  ;;  %v31_v1 = vld [vmem:[%s708_s0 + $0x8] sm:$0xff]  ;;  %537 = vset.pattern.permute.xlu0 %v571_v4  ;;  %538 = vset.pattern.permute.xlu1 %v571_v4  ;;  %v38_v6 = vld [vmem:[%s711_s3 + $0x10] sm:$0xff] }
   0x2   :  { %v32_v2 = vld [vmem:[%s710_s2] sm:$0xff]  ;;  %v514_v3 = vpack.c.bf16 %v31_v1, %v30_v0  ;;  %v33_v7 = vld [vmem:[%s710_s2 + $0x8] sm:$0xff]  ;;  %52 = vperm.xlu1 %538, %v38_v6   ;;  %v34_v9 = vld [vmem:[%s710_s2 + $0x10] sm:$0xff] }
   0x3   :  { %483 = vmatprep.mubr.msk.f32.mxu0 %vm60_vm0, %v32_v2  ;;  %v36_v5 = vld [vmem:[%s711_s3] sm:$0xff]  ;;  %v37_v8 = vld [vmem:[%s711_s3 + $0x8] sm:$0xff]  ;;  %v39_v10 = vld [vmem:[%s711_s3 + $0x18] sm:$0xff] }
   0x4   :  { %515 = vmatprep.subr.bf16.mxu0 %v514_v3  ;;  %42 = vperm.xlu0 %537, %v36_v5  }
   0x5   :  { %517 = vmatpush3.bf16.msra.mxu0 %v514_v3 }
   0x6   :  { %13 = vsyncpa [#allocation3], 0  ;;  %v35_v11 = vld [vmem:[%s710_s2 + $0x18] sm:$0xff]  ;;  %v166_v12 = vld [vmem:[%s713_s5] sm:$0xff]  ;;  %57 = vperm.xlu1 %538, %v39_v10   ;;  %vm190_vm1 = vcmask 261120   ;;  %v572_v39 = vmov 0.0|0.0  }
   0x7   :  { %v167_v13 = vld [vmem:[%s713_s5 + $0x8] sm:$0xff]  ;;  %v168_v14 = vld [vmem:[%s713_s5 + $0x10] sm:$0xff]  ;;  %v169_v15 = vld [vmem:[%s713_s5 + $0x18] sm:$0xff]  ;;  %526 = vmatprep.subr.bf16.mxu0 %v572_v39  ;;  %vm573_vm2 = vmmov 0   ;;  %v574_v40 = vmov 0.0   ;;  %vm391_vm3 = vcmask 1043456  }
   0x8   :  { %484 = vmatmul.mubr.msk.f32.vlgmr.msra.gmra.mrb[0].mxu0 %vm60_vm0, %v33_v7  ;;  %47 = vperm.xlu0 %537, %v37_v8   ;;  %v293_v16 = vld [vmem:[%s715_s7] sm:$0xff]  ;;  %v163_v36 = vld [vmem:[%s712_s4 + $0x8] sm:$0xff]  ;;  %v164_v37 = vld [vmem:[%s712_s4 + $0x10] sm:$0xff]  ;;  %vm433_vm6 = vcmask 1044480  }
   0x9   :  { %486 = vmatprep.mubr.msk.f32.mxu0 %vm60_vm0, %v34_v9  ;;  %v162_v17 = vld [vmem:[%s712_s4] sm:$0xff]  ;;  %v165_v38 = vld [vmem:[%s712_s4 + $0x18] sm:$0xff] }
   0xa   :  { %177 = vperm.xlu1 %538, %v167_v13   ;;  %497 = vmatprep.mubr.msk.f32.mxu1 %vm190_vm1, %v162_v17  ;;  %v292_v59 = vld [vmem:[%s714_s6] sm:$0xff] }
   0xb   :  { %v376_v3 = vld [vmem:[%s709_s1] sm:$0xf]  ;;  %s575_s1 = smov [#allocation2]  }
   0xc   :  { %487 = vmatmul.mubr.msk.f32.gmra.mrb[2].mxu0 %vm60_vm0, %v35_v11  ;;  %172 = vperm.xlu0 %537, %v166_v12   ;;  %v378_v4 = vrot.slane %v376_v3, 4  ;;  %v385_v13 = vmul.f32 %v376_v3, %v376_v3  ;;  %s442_s6 = sshll.u32 %s575_s1, 4  ;;  %s443_s6 = int_to_ptr.vmem [resolvable:$true] %s442_s6 }
   0xd   :  { %511 = vmatprep.mubr.msk.f32.mxu0 %vm573_vm2, %v574_v40  ;;  %s547_s18 = scalar_lea.vmem %s443_s6, 128  ;;  %p552_p1 = scmp.lt.s32.totalorder %s443_s6, %s443_s6 }
   0xe   :  { %187 = vperm.xlu1 %538, %v169_v15   ;;  %v386_v15 = vmul.f32 -0.5, %v385_v13  ;;  %p548_p0 = scmp.ne.s32.totalorder %s443_s6, %s547_s18  ;;  %p553_p2 = scmp.lt.s32.totalorder %s547_s18, %s547_s18 }
  0x10   :  { %182 = vperm.xlu0 %537, %v168_v14   ;;  %p554_p3 = por %p553_p2, %p552_p1 }
  0x12   :  { %p555_p4 = pnand %p554_p3, %p548_p0 }
  0x14   :  { %296 = vperm.xlu0 %537, %v293_v16  }
  0x81   :  { %v53_v19 = vpop.permute.xlu1 %52 }
  0x83   :  { %v43_v18 = vpop.permute.xlu0 %42 }
  0x85   :  { %v58_v26 = vpop.permute.xlu1 %57 }
  0x87   :  { %v48_v20 = vpop.permute.xlu0 %47 }
  0x89   :  { %v178_v41 = vpop.permute.xlu1 %177 }
  0x8b   :  { %v173_v42 = vpop.permute.xlu0 %172 }
  0x8d   :  { %v188_v48 = vpop.permute.xlu1 %187 }
  0x8f   :  { %v183_v51 = vpop.permute.xlu0 %182 }
  0x93   :  { %v297_v60 = vpop.permute.xlu0 %296 }
  0xdb   :  { %v485_v21 = vpop.f32.mrb[0].mxu0 }
  0xdc   :  { %v145_v22 = vadd.f32 %v485_v21, %v48_v20  ;;  %v139_v23 = vpop.f32.mrb[1].mxu0 }
  0xdd   :  { %v140_v24 = vadd.f32 %v139_v23, %v43_v18 }
  0xde   :  { %v159_v25 = vmax.f32 %v145_v22, 0.0 }
  0xdf   :  { %v158_v27 = vmax.f32 %v140_v24, 0.0  ;;  %v488_v28 = vpop.f32.mrb[2].mxu0 }
  0xe0   :  { %v155_v29 = vadd.f32 %v488_v28, %v58_v26  ;;  %v149_v30 = vpop.f32.mrb[3].mxu0 }
  0xe1   :  { %v150_v31 = vadd.f32 %v149_v30, %v53_v19  ;;  %v518_v32 = vpack.c.bf16 %v159_v25, %v158_v27 }
  0xe2   :  { %v161_v33 = vmax.f32 %v155_v29, 0.0 }
  0xe3   :  { %v160_v34 = vmax.f32 %v150_v31, 0.0  ;;  %519 = vmatprep.subr.bf16.mxu1 %v518_v32 }
  0xe4   :  { %521 = vmatpush3.bf16.msra.mxu1 %v518_v32 }
  0xe5   :  { %v522_v35 = vpack.c.bf16 %v161_v33, %v160_v34 }
  0xe7   :  { %523 = vmatprep.subr.bf16.mxu1 %v522_v35 }
  0xe8   :  { %525 = vmatpush3.bf16.msra.mxu1 %v522_v35 }
  0xeb   :  { %498 = vmatmul.mubr.msk.f32.vlgmr.msra.gmra.mrb[0].mxu1 %vm190_vm1, %v163_v36 }
  0xec   :  { %500 = vmatprep.mubr.msk.f32.mxu1 %vm190_vm1, %v164_v37 }
  0xef   :  { %501 = vmatmul.mubr.msk.f32.gmra.mrb[2].mxu1 %vm190_vm1, %v165_v38 }
 0x1be   :  { %v499_v43 = vpop.f32.mrb[0].mxu1 }
 0x1bf   :  { %v275_v44 = vadd.f32 %v499_v43, %v178_v41  ;;  %v269_v45 = vpop.f32.mrb[1].mxu1 }
 0x1c0   :  { %v270_v46 = vadd.f32 %v269_v45, %v173_v42 }
 0x1c1   :  { %v289_v47 = vmax.f32 %v275_v44, 0.0 }
 0x1c2   :  { %v288_v49 = vmax.f32 %v270_v46, 0.0  ;;  %v502_v50 = vpop.f32.mrb[2].mxu1 }
 0x1c3   :  { %v285_v52 = vadd.f32 %v502_v50, %v188_v48  ;;  %v279_v53 = vpop.f32.mrb[3].mxu1 }
 0x1c4   :  { %v527_v54 = vpack.c.bf16 %v289_v47, %v288_v49  ;;  %v280_v55 = vadd.f32 %v279_v53, %v183_v51 }
 0x1c5   :  { %v291_v56 = vmax.f32 %v285_v52, 0.0 }
 0x1c6   :  { %v290_v57 = vmax.f32 %v280_v55, 0.0  ;;  %528 = vmatpush3.bf16.msra.mxu0 %v527_v54 }
 0x1c7   :  { %529 = vmatprep.subr.bf16.mxu0 %v572_v39 }
 0x1c8   :  { %v530_v58 = vpack.c.bf16 %v291_v56, %v290_v57 }
 0x1ca   :  { %531 = vmatpush3.bf16.msra.mxu0 %v530_v58 }
 0x1cd   :  { %512 = vmatmul.mubr.msk.f32.vlgmr.msra.gmra.mrb[4].mxu0 %vm190_vm1, %v292_v59 }
 0x2a0   :  { %v368_v61 = vpop.f32.mrb[4].mxu0 }
 0x2a1   :  { %v369_v62 = vadd.f32 %v368_v61, %v297_v60  ;;  %v513_v63 = vpop.f32.mrb[5].mxu0 }
 0x2a3   :  { %v372_v0 = vmax.f32 %v369_v62, -20.0 }
 0x2a5   :  { %v373_v1 = vmin.f32 %v372_v0, 2.0 }
 0x2a7   :  { %v374_v2 = vmul.f32 1.442695, %v373_v1  ;;  %v388_v16 = vrot.slane %v373_v1, 4 }
 0x2a9   :  { %539 = vpow2.f32 %v374_v2  ;;  %v390_v18 = vsub.f32 %v386_v15, %v388_v16 }
 0x2ab   :  { %v392_v20 = vsel %vm391_vm3, %v390_v18, 0.0 }
 0x2ac   :  { %v393_v23 = vrot.slane %v392_v20, 4 }
 0x2ae   :  { %v394_v28 = vadd.f32 %v393_v23, %v392_v20 }
 0x2b0   :  { %v395_v33 = vrot.slane %v394_v28, 2 }
 0x2b2   :  { %v396_v36 = vadd.f32 %v395_v33, %v394_v28 }
 0x2b3   :  { %v540_v5 = vpop.eup %539 }
 0x2b4   :  { %v380_v6 = vmul.f32 %v540_v5, %v378_v4  ;;  %v397_v39 = vrot.slane %v396_v36, 1 }
 0x2b6   :  { %v382_v7 = vrot.slane %v380_v6, 4  ;;  %v398_v42 = vadd.f32 %v397_v39, %v396_v36 }
 0x2b8   :  { %v384_v8 = vadd.f32 %v382_v7, %v369_v62  ;;  %v459_v46 = vadd.f32 -3.675754, %v398_v42 }
 0x2ba   :  { %v401_v9 = vmul.f32 -2.0, %v384_v8  ;;  %v400_v31 = vsub.f32 0.6931472, %v384_v8 }
 0x2bc   :  { %v405_v10 = vand.u32 2147483647, %v401_v9  ;;  %v402_v27 = vmax.f32 %v401_v9, 0.0  ;;  %vm403_vm5 = vcmp.ne.f32.partialorder %v401_v9, %v401_v9 }
 0x2be   :  { %v406_v11 = vsub.f32 0.0, %v405_v10 }
 0x2c0   :  { %v407_v12 = vmul.f32 1.442695, %v406_v11 }
 0x2c2   :  { %541 = vpow2.f32 %v407_v12 }
 0x2cc   :  { %v542_v14 = vpop.eup %541 }
 0x2cd   :  { %v409_v17 = vadd.f32 1.0, %v542_v14  ;;  %v412_v19 = vmul.f32 -0.5, %v542_v14  ;;  %v415_v22 = vand.u32 2147483647, %v542_v14 }
 0x2cf   :  { %543 = vlog2.f32 %v409_v17  ;;  %v413_v21 = vadd.f32 1.0, %v412_v19  ;;  %vm416_vm4 = vcmp.lt.f32.partialorder %v415_v22, 0.0004427343 }
 0x2d0   :  { %545 = vtanh.f32 %v384_v8 }
 0x2d1   :  { %v414_v26 = vmul.f32 %v542_v14, %v413_v21 }
 0x2d9   :  { %v544_v24 = vpop.eup %543 }
 0x2da   :  { %v411_v25 = vmul.f32 0.6931472, %v544_v24  ;;  %v546_v45 = vpop.eup %545 }
 0x2db   :  { %v431_v49 = vmul.f32 2.0, %v546_v45 }
 0x2dc   :  { %v417_v29 = vsel %vm416_vm4, %v414_v26, %v411_v25 }
 0x2dd   :  { %v418_v30 = vadd.f32 %v417_v29, %v402_v27 }
 0x2df   :  { %v419_v32 = vsel %vm403_vm5, %v401_v9, %v418_v30 }
 0x2e0   :  { %v420_v34 = vsub.f32 %v400_v31, %v419_v32 }
 0x2e2   :  { %v421_v35 = vmul.f32 2.0, %v420_v34 }
 0x2e4   :  { %v422_v37 = vsel %vm391_vm3, %v421_v35, 0.0 }
 0x2e5   :  { %v423_v38 = vrot.slane %v422_v37, 4 }
 0x2e7   :  { %v424_v40 = vadd.f32 %v423_v38, %v422_v37 }
 0x2e9   :  { %v425_v41 = vrot.slane %v424_v40, 2 }
 0x2eb   :  { %v426_v43 = vadd.f32 %v425_v41, %v424_v40 }
 0x2ed   :  { %v427_v44 = vrot.slane %v426_v43, 1 }
 0x2ef   :  { %v428_v47 = vadd.f32 %v427_v44, %v426_v43 }
 0x2f1   :  { %v429_v48 = vsub.f32 %v459_v46, %v428_v47 }
 0x2f3   :  { %v432_v50 = vsel %vm391_vm3, %v431_v49, %v429_v48 }
 0x2f4   :  { %v434_v51 = vsel %vm433_vm6, %v432_v50, 0.0 }
 0x2f5   :  { %435 = vst [vmem:[#allocation2] sm:$0xff] %v434_v51 }
 0x2f6   :  { %558 = shalt.err (!%p555_p4)
}
 0x2f7   :  { %s559_s21 = scalar_lea.hbm %s716_s8, 128 }
 0x2f8   :  { %p560_p5 = scmp.ne.s32.totalorder %s716_s8, %s559_s21  ;;  %p563_p6 = scmp.lt.u32.totalorder %s559_s21, %s716_s8 }
 0x2fa   :  { %p565_p7 = pnand %p563_p6, %p560_p5 }
 0x2fc   :  { %568 = shalt.err (!%p565_p7)
}
 0x2fd   :  { %445 = dma.vmem_to_hbm [thread:$0]  %s443_s6, 128, %s716_s8, [#allocation3]  }
 0x2fe   :  { %569 = dma.done.wait [#allocation3], 128  }
 0x2ff   :  { %570 = vsyncadd [#allocation3], 4294967168 }
 0x300   :  { %449 = vsyncpa [#allocation3], 1 }

</bundles_post_ra>
